<compile_context>
chip_gen: v6e
topology: v6e:2x2x1
jax: 0.10.0
libtpu: 0.0.40
codegen_flags: <defaults>
</compile_context>

<pallas_src>
import jax
import jax.numpy as jnp
from jax.experimental import pallas as pl
from jax.experimental.pallas import tpu as pltpu

_LANE = 128
_SUBLANE = 8


def _round_up(a, b):
    return (a + b - 1) // b * b


def _linear_kernel(x_ref, w_ref, b_ref, o_ref):
    # x_ref: (tm, Kf)   w_ref: (Kf, Nf) pre-transposed/folded   b_ref: (1, Nf)
    acc = jnp.dot(x_ref[...], w_ref[...], preferred_element_type=jnp.float32)
    o_ref[...] = (acc + b_ref[...].astype(jnp.float32)).astype(o_ref.dtype)


def _device_kind():
    try:
        return jax.devices()[0].device_kind.lower()
    except Exception:
        return ""


def _plan_tiles(m_rows, k_fold, n_fold, itemsize):
    """Pick (tm, grid_m, vmem_limit_bytes) for the streamed row dimension."""
    kind = _device_kind()
    is_v7 = ("v7" in kind) or ("7x" in kind)
    big_vmem = (not is_v7) and any(t in kind for t in ("v4", "v5", "v6"))
    if big_vmem:                      # 128 MiB physical VMEM generations
        budget, vmem_limit = 24 * 1024 * 1024, 64 * 1024 * 1024
    else:                             # v7x (64 MiB VMEM / TC) or unknown
        budget, vmem_limit = 16 * 1024 * 1024, 32 * 1024 * 1024

    kp = _round_up(k_fold, _LANE)
    np_ = _round_up(n_fold, _LANE)
    # Per-row VMEM bytes: double-buffered x tile + double-buffered out tile
    # + the compiler-internal f32 matmul accumulator before the bias/cast.
    bytes_per_row = 2 * itemsize * kp + 2 * itemsize * np_ + 4 * np_
    tm_max = (budget // bytes_per_row) // _SUBLANE * _SUBLANE
    tm_max = max(_SUBLANE, min(tm_max, 8192))

    if m_rows <= tm_max:
        tm, grid_m = m_rows, 1        # single block == full dim (always legal)
    else:
        g = pl.cdiv(m_rows, tm_max)   # rebalanced tiles: padding < 8 rows/blk
        tm = _round_up(pl.cdiv(m_rows, g), _SUBLANE)
        grid_m = pl.cdiv(m_rows, tm)

    # v7x megacore: guarantee >=2 blocks once M is non-trivial so the
    # "parallel" grid axis actually shards across both TensorCores.
    if is_v7 and grid_m < 2 and m_rows > 1024:
        tm = _round_up(pl.cdiv(m_rows, 2), _SUBLANE)
        grid_m = pl.cdiv(m_rows, tm)
    return tm, grid_m, vmem_limit


def dim_converter_forward(x, weight, bias, *, _force_tm=None):
    """Pallas equivalent of nn.Linear(stu_hidden, tea_hidden): y = x @ W.T + b.

    x:      (..., stu_hidden)
    weight: (tea_hidden, stu_hidden)   -- PyTorch layout
    bias:   (tea_hidden,)
    returns (..., tea_hidden)
    """
    orig_shape = x.shape
    K = orig_shape[-1]
    N, Kw = weight.shape
    assert Kw == K, "weight must be (tea_hidden, stu_hidden)"

    x2d = x.reshape(-1, K)
    M = x2d.shape[0]

    # Row folding factor: largest power of two <= 128//K that divides M, so we
    # never need a wrapper-side pad of x or a slice of the output.
    fold = 128 // K if (0 < K < 128 and 128 % K == 0) else 1
    while fold > 1 and M % fold != 0:
        fold //= 2

    Kf, Nf, Mf = K * fold, N * fold, M // fold

    w_t = jnp.transpose(weight)                      # (K, N): contract dim 0
    if fold > 1:
        # One-time tiny (Kf x Nf) block-diagonal folded weight + tiled bias.
        w_eff = jnp.kron(jnp.eye(fold, dtype=w_t.dtype), w_t)     # (Kf, Nf)
        b_eff = jnp.tile(bias.reshape(1, N), (1, fold))           # (1, Nf)
        x_eff = x2d.reshape(Mf, Kf)                  # free metadata reshape
    else:
        w_eff, b_eff, x_eff = w_t, bias.reshape(1, N), x2d

    tm, grid_m, vmem_limit = _plan_tiles(Mf, Kf, Nf, x.dtype.itemsize)
    if _force_tm is not None:                        # test hook (multi-block)
        tm = _force_tm
        grid_m = pl.cdiv(Mf, tm)

    cost = pl.CostEstimate(
        flops=2 * Mf * Kf * Nf,
        transcendentals=0,
        bytes_accessed=(x_eff.size * x_eff.dtype.itemsize
                        + w_eff.size * w_eff.dtype.itemsize
                        + b_eff.size * b_eff.dtype.itemsize
                        + Mf * Nf * x.dtype.itemsize),
    )

    out = pl.pallas_call(
        _linear_kernel,
        out_shape=jax.ShapeDtypeStruct((Mf, Nf), x.dtype),
        grid_spec=pltpu.PrefetchScalarGridSpec(
            num_scalar_prefetch=0,
            grid=(grid_m,),
            in_specs=[
                pl.BlockSpec((tm, Kf), lambda i: (i, 0)),   # streamed x rows
                pl.BlockSpec((Kf, Nf), lambda i: (0, 0)),   # weight, resident
                pl.BlockSpec((1, Nf), lambda i: (0, 0)),    # bias, resident
            ],
            out_specs=pl.BlockSpec((tm, Nf), lambda i: (i, 0)),
        ),
        compiler_params=pltpu.CompilerParams(
            dimension_semantics=("parallel",),
            vmem_limit_bytes=vmem_limit,
        ),
        cost_estimate=cost,
    )(x_eff, w_eff, b_eff)

    # (Mf, Nf) is bit-identical in memory to (M, N): free metadata reshape.
    return out.reshape(*orig_shape[:-1], N)


if __name__ == "__main__":
    # config.stu_hidden_size = 32, config.tea_hidden_size = 64
    stu_hidden, tea_hidden = 32, 64
    batch, seq = 2, 8

    key = jax.random.PRNGKey(0)
    kx, kw, kb = jax.random.split(key, 3)

    x = jax.random.normal(kx, (batch, seq, stu_hidden), dtype=jnp.float32)
    # Deterministic synthetic parameters (PyTorch layout: (out, in) and (out,))
    weight = jax.random.normal(kw, (tea_hidden, stu_hidden), dtype=jnp.float32) * 0.02
    bias = jax.random.normal(kb, (tea_hidden,), dtype=jnp.float32) * 0.01

    y = dim_converter_forward(x, weight, bias)
    jax.block_until_ready(y)
    y_ref = x @ weight.T + bias
    assert y.shape == (batch, seq, tea_hidden)
    assert jnp.allclose(y, y_ref, atol=1e-5, rtol=1e-5)

    # Row count not divisible by 4 -> exercises the fold fallback (no pads).
    x_odd = jax.random.normal(kx, (3, 7, stu_hidden), dtype=jnp.float32)
    y_odd = dim_converter_forward(x_odd, weight, bias)
    jax.block_until_ready(y_odd)
    assert jnp.allclose(y_odd, x_odd @ weight.T + bias, atol=1e-5, rtol=1e-5)

    # Multi-block grid with a ragged last block (forced small tile) ->
    # exercises edge-block clamping / masked writeback on the row axis.
    x_big = jax.random.normal(kx, (10, 10, stu_hidden), dtype=jnp.float32)
    y_big = dim_converter_forward(x_big, weight, bias, _force_tm=8)
    jax.block_until_ready(y_big)
    assert jnp.allclose(y_big, x_big @ weight.T + bias, atol=1e-5, rtol=1e-5)

    print("KERNEL_OK")
</pallas_src>

<mosaic_0001>
module attributes {stable_mosaic.version = 11 : i64} {
  func.func @_linear_kernel(%arg0: i32, %arg1: memref<4x128xf32, #tpu.memory_space<vmem>>, %arg2: memref<128x256xf32, #tpu.memory_space<vmem>>, %arg3: memref<1x256xf32, #tpu.memory_space<vmem>>, %arg4: memref<4x256xf32, #tpu.memory_space<vmem>>) attributes {dimension_semantics = [#tpu.dimension_semantics<parallel>], iteration_bounds = array<i64: 1>, scalar_prefetch = 0 : i64, scratch_operands = 0 : i64, tpu.core_type = #tpu.core_type<tc>, window_params = [{transform_indices = @transform_0, window_bounds = array<i64: 4, 128>}, {pipeline_mode = #tpu.pipeline_mode<synchronous>, transform_indices = @transform_1, window_bounds = array<i64: 128, 256>}, {pipeline_mode = #tpu.pipeline_mode<synchronous>, transform_indices = @transform_2, window_bounds = array<i64: 1, 256>}, {transform_indices = @transform_3, window_bounds = array<i64: 4, 256>}]} {
    %c0 = arith.constant 0 : index
    %c0_0 = arith.constant 0 : index
    %0 = vector.load %arg1[%c0, %c0_0] : memref<4x128xf32, #tpu.memory_space<vmem>>, vector<4x128xf32>
    %c0_1 = arith.constant 0 : index
    %c0_2 = arith.constant 0 : index
    %1 = vector.load %arg2[%c0_1, %c0_2] : memref<128x256xf32, #tpu.memory_space<vmem>>, vector<128x256xf32>
    %cst = arith.constant dense<0.000000e+00> : vector<4x256xf32>
    %2 = tpu.matmul %0, %1, %cst {dimension_numbers = #tpu.dot_dimension_numbers<[1], [0], [0], [1], [0, 0, 1, 1], [], []>} : vector<4x128xf32>, vector<128x256xf32>, vector<4x256xf32> -> vector<4x256xf32>
    %c0_3 = arith.constant 0 : index
    %c0_4 = arith.constant 0 : index
    %3 = vector.load %arg3[%c0_3, %c0_4] : memref<1x256xf32, #tpu.memory_space<vmem>>, vector<1x256xf32>
    %4 = vector.broadcast %3 : vector<1x256xf32> to vector<4x256xf32>
    %5 = arith.addf %2, %4 : vector<4x256xf32>
    %c0_5 = arith.constant 0 : index
    %c0_6 = arith.constant 0 : index
    %6 = vector.load %arg4[%c0_5, %c0_6] : memref<4x256xf32, #tpu.memory_space<vmem>>, vector<4x256xf32>
    tpu.vector_store %arg4[%c0_5, %c0_6], %5 {strides = array<i32>} : memref<4x256xf32, #tpu.memory_space<vmem>>, vector<4x256xf32>,
    return
  }
  func.func @transform_0(%arg0: i32) -> (i32, i32) {
    %c0_i32 = arith.constant 0 : i32
    %c0_i32_0 = arith.constant 0 : i32
    return %arg0, %c0_i32 : i32, i32
  }
  func.func @transform_1(%arg0: i32) -> (i32, i32) {
    %c0_i32 = arith.constant 0 : i32
    %c0_i32_0 = arith.constant 0 : i32
    %c0_i32_1 = arith.constant 0 : i32
    return %c0_i32, %c0_i32_0 : i32, i32
  }
  func.func @transform_2(%arg0: i32) -> (i32, i32) {
    %c0_i32 = arith.constant 0 : i32
    %c0_i32_0 = arith.constant 0 : i32
    %c0_i32_1 = arith.constant 0 : i32
    return %c0_i32, %c0_i32_0 : i32, i32
  }
  func.func @transform_3(%arg0: i32) -> (i32, i32) {
    %c0_i32 = arith.constant 0 : i32
    %c0_i32_0 = arith.constant 0 : i32
    return %arg0, %c0_i32 : i32, i32
  }
}

</mosaic_0001>

<bundles_post_ra>
// kernel: tpu_custom_call.1
= control target key start
LH: loop header
LB: loop body
LE: loop exit
PB: predicated region body
PF: predicated region fallthrough
CT: control target
= control target key end

     0   :  { %8 = vsyncpa [#allocation3], 0  ;;  %s288_s0 = inlined_call_operand.hbm [shape: f32[4,128], index: 0, kind: input, shape index: {}]   ;;  %s289_s1 = inlined_call_operand.hbm [shape: f32[128,256], index: 1, kind: input, shape index: {}]   ;;  %s290_s2 = inlined_call_operand.vmem [shape: f32[1,256], index: 2, kind: input, shape index: {}]   ;;  %s291_s3 = inlined_call_operand.hbm [shape: f32[4,256], index: 3, kind: output, shape index: {}]  }
   0x1   :  { %9 = vsyncpa [#allocation6], 0 }
   0x2   :  { %10 = vsyncpa [#allocation4], 0  ;;  %s250_s12 = smov [#allocation2]   ;;  %s251_s14 = smov [#allocation5]  }
   0x3   :  { %s17_s13 = sshll.u32 %s250_s12, 4  ;;  %s26_s15 = sshll.u32 %s251_s14, 4  ;;  %s18_s13 = int_to_ptr.vmem [resolvable:$true] %s17_s13  ;;  %s27_s15 = int_to_ptr.vmem [resolvable:$true] %s26_s15 }
   0x4   :  { %s192_s16 = scalar_lea.vmem %s18_s13, 64  ;;  %p197_p1 = scmp.lt.s32.totalorder %s18_s13, %s18_s13 }
   0x5   :  { %p193_p0 = scmp.ne.s32.totalorder %s18_s13, %s192_s16  ;;  %p198_p2 = scmp.lt.s32.totalorder %s192_s16, %s192_s16 }
   0x7   :  { %p199_p3 = por %p198_p2, %p197_p1 }
   0x9   :  { %p200_p4 = pnand %p199_p3, %p193_p0 }
   0xb   :  { %203 = shalt.err (!%p200_p4)
}
   0xc   :  { %20 = dma.hbm_to_vmem [thread:$0]  %s288_s0, 64, %s18_s13, [#allocation3]  }
   0xd   :  { %s212_s19 = scalar_lea.vmem %s27_s15, 4096  ;;  %p217_p6 = scmp.lt.s32.totalorder %s27_s15, %s27_s15 }
   0xe   :  { %p213_p5 = scmp.ne.s32.totalorder %s27_s15, %s212_s19  ;;  %p218_p7 = scmp.lt.s32.totalorder %s212_s19, %s212_s19 }
  0x10   :  { %p219_p8 = por %p218_p7, %p217_p6 }
  0x12   :  { %p220_p9 = pnand %p219_p8, %p213_p5 }
  0x14   :  { %223 = shalt.err (!%p220_p9)
}
  0x15   :  { %s252_s20 = smov 256   ;;  %s253_s21 = smov 16  }
  0x16   :  { %32 = dma.hbm_to_vmem [thread:$0]  %s289_s1, 4096, %s27_s15, [#allocation6], %s252_s20, %s252_s20, %s253_s21  }
  0x17   :  { %244 = dma.done.wait [#allocation3], 64  }
  0x18   :  { %245 = vsyncadd [#allocation3], 4294967232 }
  0x19   :  { %246 = dma.done.wait [#allocation6], 4096  }
  0x1a   :  { %247 = vsyncadd [#allocation6], 4294963200  ;;  %v254_v0 = vmov 0.0   ;;  %v73_v1 = vld [vmem:[#allocation5 + $0xf8] sm:$0xff]  ;;  %v72_v2 = vld [vmem:[#allocation5 + $0xf0] sm:$0xff]  ;;  %v76_v34 = vlaneseq  ;;  %s255_s24 = smov [#allocation7]  }
  0x1b   :  { %150 = vmatprep.mubr.f32.mxu0 %v254_v0  ;;  %v71_v3 = vld [vmem:[#allocation5 + $0xe8] sm:$0xff]  ;;  %86 = vmatprep.subr.mxu0 %v73_v1  ;;  %v70_v4 = vld [vmem:[#allocation5 + $0xe0] sm:$0xff]  ;;  %v69_v5 = vld [vmem:[#allocation5 + $0xd8] sm:$0xff]  ;;  %s168_s25 = sshll.u32 %s255_s24, 4  ;;  %s169_s25 = int_to_ptr.vmem [resolvable:$true] %s168_s25 }
  0x1c   :  { %87 = vmatpush1.msra.mxu0 %v72_v2  ;;  %v68_v6 = vld [vmem:[#allocation5 + $0xd0] sm:$0xff]  ;;  %v67_v7 = vld [vmem:[#allocation5 + $0xc8] sm:$0xff]  ;;  %v66_v8 = vld [vmem:[#allocation5 + $0xc0] sm:$0xff]  ;;  %v77_v35 = vshrl.u32 %v76_v34, 7  ;;  %s224_s26 = scalar_lea.vmem %s169_s25, 128  ;;  %p229_p11 = scmp.lt.s32.totalorder %s169_s25, %s169_s25 }
  0x1d   :  { %88 = vmatprep.subr.mxu0 %v71_v3  ;;  %v65_v9 = vld [vmem:[#allocation5 + $0xb8] sm:$0xff]  ;;  %v64_v10 = vld [vmem:[#allocation5 + $0xb0] sm:$0xff]  ;;  %v63_v11 = vld [vmem:[#allocation5 + $0xa8] sm:$0xff]  ;;  %p225_p10 = scmp.ne.s32.totalorder %s169_s25, %s224_s26  ;;  %p230_p12 = scmp.lt.s32.totalorder %s224_s26, %s224_s26 }
  0x1e   :  { %89 = vmatpush1.msra.mxu0 %v70_v4  ;;  %v62_v12 = vld [vmem:[#allocation5 + $0xa0] sm:$0xff]  ;;  %v61_v13 = vld [vmem:[#allocation5 + $0x98] sm:$0xff]  ;;  %v60_v14 = vld [vmem:[#allocation5 + $0x90] sm:$0xff]  ;;  %v78_v36 = vsub.s32 0, %v77_v35  ;;  %v82_v37 = vsub.s32 1, %v77_v35 }
  0x1f   :  { %90 = vmatprep.subr.mxu0 %v69_v5  ;;  %v59_v15 = vld [vmem:[#allocation5 + $0x88] sm:$0xff]  ;;  %v58_v16 = vld [vmem:[#allocation5 + $0x80] sm:$0xff]  ;;  %v57_v17 = vld [vmem:[#allocation5 + $0x78] sm:$0xff]  ;;  %p231_p13 = por %p230_p12, %p229_p11 }
  0x20   :  { %91 = vmatpush1.msra.mxu0 %v68_v6  ;;  %v56_v18 = vld [vmem:[#allocation5 + $0x70] sm:$0xff]  ;;  %v55_v19 = vld [vmem:[#allocation5 + $0x68] sm:$0xff]  ;;  %v54_v20 = vld [vmem:[#allocation5 + $0x60] sm:$0xff] }
  0x21   :  { %92 = vmatprep.subr.mxu0 %v67_v7  ;;  %v53_v21 = vld [vmem:[#allocation5 + $0x58] sm:$0xff]  ;;  %v52_v22 = vld [vmem:[#allocation5 + $0x50] sm:$0xff]  ;;  %v51_v23 = vld [vmem:[#allocation5 + $0x48] sm:$0xff]  ;;  %p232_p0 = pnand %p231_p13, %p225_p10 }
  0x22   :  { %93 = vmatpush1.msra.mxu0 %v66_v8  ;;  %v50_v24 = vld [vmem:[#allocation5 + $0x40] sm:$0xff]  ;;  %v49_v25 = vld [vmem:[#allocation5 + $0x38] sm:$0xff]  ;;  %v48_v26 = vld [vmem:[#allocation5 + $0x30] sm:$0xff] }
  0x23   :  { %94 = vmatprep.subr.mxu0 %v65_v9  ;;  %v47_v27 = vld [vmem:[#allocation5 + $0x28] sm:$0xff]  ;;  %v46_v28 = vld [vmem:[#allocation5 + $0x20] sm:$0xff]  ;;  %v45_v29 = vld [vmem:[#allocation5 + $0x18] sm:$0xff] }
  0x24   :  { %95 = vmatpush1.msra.mxu0 %v64_v10  ;;  %v44_v30 = vld [vmem:[#allocation5 + $0x10] sm:$0xff]  ;;  %v43_v31 = vld [vmem:[#allocation5 + $0x8] sm:$0xff]  ;;  %v42_v32 = vld [vmem:[#allocation5] sm:$0xff] }
  0x25   :  { %96 = vmatprep.subr.mxu0 %v63_v11  ;;  %v41_v33 = vld [vmem:[#allocation2] sm:$0xf] }
  0x26   :  { %97 = vmatpush1.msra.mxu0 %v62_v12  ;;  %v74_v38 = vld [vmem:[%s290_s2] sm:$0x3] }
  0x27   :  { %98 = vmatprep.subr.mxu0 %v61_v13  ;;  %v79_v39 = vrot.slane %v74_v38, %v78_v36  ;;  %v83_v40 = vrot.slane %v74_v38, %v82_v37 }
  0x28   :  { %99 = vmatpush1.msra.mxu0 %v60_v14 }
  0x29   :  { %100 = vmatprep.subr.mxu0 %v59_v15 }
  0x2a   :  { %101 = vmatpush1.msra.mxu0 %v58_v16 }
  0x2b   :  { %102 = vmatprep.subr.mxu0 %v57_v17 }
  0x2c   :  { %103 = vmatpush1.msra.mxu0 %v56_v18 }
  0x2d   :  { %104 = vmatprep.subr.mxu0 %v55_v19 }
  0x2e   :  { %105 = vmatpush1.msra.mxu0 %v54_v20 }
  0x2f   :  { %106 = vmatprep.subr.mxu0 %v53_v21 }
  0x30   :  { %107 = vmatpush1.msra.mxu0 %v52_v22 }
  0x31   :  { %108 = vmatprep.subr.mxu0 %v51_v23 }
  0x32   :  { %109 = vmatpush1.msra.mxu0 %v50_v24 }
  0x33   :  { %110 = vmatprep.subr.mxu0 %v49_v25 }
  0x34   :  { %111 = vmatpush1.msra.mxu0 %v48_v26 }
  0x35   :  { %112 = vmatprep.subr.mxu0 %v47_v27 }
  0x36   :  { %113 = vmatpush1.msra.mxu0 %v46_v28 }
  0x37   :  { %114 = vmatprep.subr.mxu0 %v45_v29 }
  0x38   :  { %115 = vmatpush1.msra.mxu0 %v44_v30 }
  0x39   :  { %116 = vmatprep.subr.mxu0 %v43_v31 }
  0x3a   :  { %117 = vmatpush1.msra.mxu0 %v42_v32 }
  0x3b   :  { %151 = vmatmul.mubr.f32.vlgmr.msra.gmra.mxu0 %v41_v33 }
  0xfb   :  { %v152_v41 = vpop.f32.mrf.mxu0 }
  0xfc   :  { %v153_v43 = vadd.f32 %v152_v41, %v79_v39 }
  0xfd   :  { %v154_v42 = vpop.f32.mrf.mxu0 }
  0xfe   :  { %v155_v44 = vadd.f32 %v154_v42, %v83_v40 }
 0x100   :  { %v159_v45 = vcombine.low %v153_v43, %v155_v44 }
 0x102   :  { %161 = vst [vmem:[#allocation7] sm:$0xff] %v159_v45 }
 0x103   :  { %235 = shalt.err (!%p232_p0)
}
 0x104   :  { %171 = dma.vmem_to_hbm [thread:$0]  %s169_s25, 128, %s291_s3, [#allocation4]  }
 0x105   :  { %248 = dma.done.wait [#allocation4], 128  }
 0x106   :  { %249 = vsyncadd [#allocation4], 4294967168 }
 0x107   :  { %175 = vsyncpa [#allocation3], 1 }
 0x108   :  { %176 = vsyncpa [#allocation6], 1 }
 0x109   :  { %177 = vsyncpa [#allocation4], 1 }

</bundles_post_ra>
